<compile_context>
chip_gen: v7x
topology: tpu7x:2x2x1
jax: 0.10.0
libtpu: 0.0.40
codegen_flags: <defaults>
</compile_context>

<pallas_src>
import jax
import jax.numpy as jnp
from jax.experimental import pallas as pl
from jax.experimental.pallas import tpu as pltpu

DEPTH = 3            # DeepMF default depth
LEAKY_SLOPE = 0.01   # torch.nn.functional.leaky_relu default


def _round_up(x, m):
    return (x + m - 1) // m * m


# --------------------------------- kernel ---------------------------------

def deepmf_kernel(am_ref,                       # (DEPTH,) f32 SMEM: att[e] * multi
                  x_ref,                        # (d_in_pad, BLOCK_B) bf16, feature-major
                  w0_ref, b0_ref,               # (2*dims, d_in_pad) bf16, (2*dims, 1) f32
                  w1_ref, b1_ref,               # (2*dims, 2*dims)  bf16, (2*dims, 1) f32
                  w2_ref, b2_ref,
                  out_ref):                     # (1, BLOCK_B) f32, lane-dense
    cdt = x_ref.dtype

    # Layer 0: shared input, fused [base ; click] rows of the transposed weight (MXU LHS);
    # batch rides the MXU free dimension / vreg lanes.
    h = jnp.dot(w0_ref[...], x_ref[...],
                preferred_element_type=jnp.float32) + b0_ref[...]        # (2*dims, B) f32
    dims = h.shape[0] // 2
    hb, hc = h[:dims, :], h[dims:, :]
    acc = am_ref[0] * (hb * hc)                                          # (dims, B) f32
    xcat = jnp.where(h > 0, h, LEAKY_SLOPE * h).astype(cdt)              # leaky -> bf16

    # Layers 1..DEPTH-1: block-diagonal fused weight on the stacked [xb ; xc] activation.
    for e, (w_ref, b_ref) in enumerate(((w1_ref, b1_ref), (w2_ref, b2_ref)), start=1):
        h = jnp.dot(w_ref[...], xcat, preferred_element_type=jnp.float32) + b_ref[...]
        hb, hc = h[:dims, :], h[dims:, :]
        if e == DEPTH - 1:
            acc = acc + hb * hc               # att[e]*multi pre-folded into Wb/bb on host
        else:
            acc = acc + am_ref[e] * (hb * hc)
            xcat = jnp.where(h > 0, h, LEAKY_SLOPE * h).astype(cdt)

    # Single deferred 32-sublane reduction -> lane-dense (1, BLOCK_B) row + sigmoid (EUP).
    out_ref[...] = jax.nn.sigmoid(jnp.sum(acc, axis=0, keepdims=True))


# ----------------------------- host-side packing -----------------------------

def embed_mean(emb_tables, cats):
    """cats: (n_cat, B) int32 -> (B, dims) mean of per-column embeddings."""
    acc = emb_tables[0][cats[0]]
    for i in range(1, len(emb_tables)):
        acc = acc + emb_tables[i][cats[i]]
    return acc / len(emb_tables)


def pack_params(base_ws, base_bs, click_ws, click_bs, multi, att, d_in_pad,
                compute_dtype):
    """Transposed-LHS fused weights; att[last]*multi folded into the last base layer."""
    dims = base_ws[-1].shape[1]
    am = (att.reshape(-1) * multi.reshape(())).astype(jnp.float32)       # (DEPTH,)

    # Layer 0: rows = [base ; click] outputs, cols = padded input features.
    w0 = jnp.concatenate([base_ws[0].T, click_ws[0].T], axis=0)          # (2*dims, d_in)
    w0 = jnp.pad(w0, ((0, 0), (0, d_in_pad - w0.shape[1]))).astype(compute_dtype)
    b0 = jnp.concatenate([base_bs[0].reshape(-1),
                          click_bs[0].reshape(-1)]).reshape(-1, 1).astype(jnp.float32)
    packed = [(w0, b0)]

    z = jnp.zeros((dims, dims), jnp.float32)
    for e in range(1, DEPTH):
        wb, bb = base_ws[e].T, base_bs[e].reshape(-1)
        if e == DEPTH - 1:                    # fold att[last]*multi into the base branch
            wb, bb = am[e] * wb, am[e] * bb
        w = jnp.block([[wb, z],
                       [z, click_ws[e].T]]).astype(compute_dtype)        # (2*dims, 2*dims)
        b = jnp.concatenate([bb, click_bs[e].reshape(-1)]
                            ).reshape(-1, 1).astype(jnp.float32)
        packed.append((w, b))
    return am, packed


# ------------------------------- pallas wrapper -------------------------------

def deepmf_pallas(xT, am, packed, *, block_b):
    """xT: (d_in_pad, B_pad) bf16 feature-major activations -> (1, B_pad) f32 sigmoid."""
    d_in_pad, B_pad = xT.shape
    dims2 = packed[0][0].shape[0]             # 2*dims
    assert B_pad % block_b == 0
    grid = (B_pad // block_b,)

    xmap = lambda i, am_ref: (0, i)           # batch-tiled stream (lane axis)
    wmap = lambda i, am_ref: (0, 0)           # weights/biases resident, DMA'd once

    in_specs = [pl.BlockSpec((d_in_pad, block_b), xmap)]
    flat_params = []
    for w, b in packed:
        in_specs.append(pl.BlockSpec(w.shape, wmap))
        in_specs.append(pl.BlockSpec(b.shape, wmap))
        flat_params += [w, b]

    flops = 2 * B_pad * (d_in_pad * dims2 + (DEPTH - 1) * dims2 * dims2)
    bytes_accessed = (xT.size * xT.dtype.itemsize
                      + sum(w.size * w.dtype.itemsize + b.size * b.dtype.itemsize
                            for w, b in packed)
                      + B_pad * 4)

    return pl.pallas_call(
        deepmf_kernel,
        out_shape=jax.ShapeDtypeStruct((1, B_pad), jnp.float32),
        grid_spec=pltpu.PrefetchScalarGridSpec(
            num_scalar_prefetch=1,
            grid=grid,
            in_specs=in_specs,
            out_specs=pl.BlockSpec((1, block_b), xmap),
        ),
        compiler_params=pltpu.CompilerParams(
            dimension_semantics=("parallel",)),
        cost_estimate=pl.CostEstimate(flops=flops, transcendentals=B_pad,
                                      bytes_accessed=bytes_accessed),
    )(am, xT, *flat_params)


def deepmf_forward(cats, nums, emb_tables, base_ws, base_bs, click_ws, click_bs,
                   multi, att, *, block_b=4096, compute_dtype=jnp.bfloat16):
    """Eval-mode DeepMF forward. cats: (n_cat, B) int32, nums: (B, num_dims) f32."""
    B, num_dims = nums.shape
    dims = base_ws[-1].shape[1]
    d_in = dims + num_dims
    d_in_pad = _round_up(d_in, 8)

    # Batch tile on 128-lane boundaries; clamp aggressively for tiny batches.
    block_b = max(128, _round_up(min(block_b, _round_up(B, 128)), 128))
    B_pad = _round_up(B, block_b)

    # Glue (data-dependent 8-table gather + mean) stays in JAX; padded, feature-major
    # bf16 activation is built in one fused write when jitted.
    emb = embed_mean(emb_tables, cats)                                    # (B, dims) f32
    x0T = jnp.concatenate([emb.T, nums.T], axis=0).astype(compute_dtype)  # (d_in, B)
    xT = jnp.zeros((d_in_pad, B_pad), compute_dtype).at[:d_in, :B].set(x0T)

    am, packed = pack_params(base_ws, base_bs, click_ws, click_bs, multi, att,
                             d_in_pad, compute_dtype)
    out = deepmf_pallas(xT, am, packed, block_b=block_b)                  # (1, B_pad)
    return out[0, :B].reshape(B, 1)


# ------------------------------ JAX references ------------------------------

def reference_forward_f32(x0, base_ws, base_bs, click_ws, click_bs, multi, att):
    """Pure-f32 reference mirroring the PyTorch eval-mode forward exactly."""
    hi = jax.lax.Precision.HIGHEST

    def leaky(x):
        return jnp.where(x > 0, x, LEAKY_SLOPE * x)

    xb = xc = x0
    logit = 0.0
    for e in range(DEPTH):
        hb = jnp.dot(xb, base_ws[e], precision=hi) + base_bs[e]
        hc = jnp.dot(xc, click_ws[e], precision=hi) + click_bs[e]
        logit = logit + (jnp.sum(hb * hc, axis=1, keepdims=True)
                         * multi.reshape(()) * att[e, 0])
        xb, xc = leaky(hb), leaky(hc)
    return jax.nn.sigmoid(logit)


def reference_forward_matched(cats, nums, emb_tables, base_ws, base_bs, click_ws,
                              click_bs, multi, att, compute_dtype=jnp.bfloat16):
    """Plain-JAX mirror of the kernel math (same packing, bf16 MXU operands)."""
    B, num_dims = nums.shape
    dims = base_ws[-1].shape[1]
    d_in = dims + num_dims
    d_in_pad = _round_up(d_in, 8)

    emb = embed_mean(emb_tables, cats)
    x0T = jnp.concatenate([emb.T, nums.T], axis=0).astype(compute_dtype)
    xT = jnp.zeros((d_in_pad, B), compute_dtype).at[:d_in, :].set(x0T)
    am, packed = pack_params(base_ws, base_bs, click_ws, click_bs, multi, att,
                             d_in_pad, compute_dtype)

    w0, b0 = packed[0]
    h = jnp.dot(w0, xT, preferred_element_type=jnp.float32) + b0
    hb, hc = h[:dims], h[dims:]
    acc = am[0] * (hb * hc)
    xcat = jnp.where(h > 0, h, LEAKY_SLOPE * h).astype(compute_dtype)
    for e in range(1, DEPTH):
        w, b = packed[e]
        h = jnp.dot(w, xcat, preferred_element_type=jnp.float32) + b
        hb, hc = h[:dims], h[dims:]
        acc = acc + (hb * hc if e == DEPTH - 1 else am[e] * (hb * hc))
        if e < DEPTH - 1:
            xcat = jnp.where(h > 0, h, LEAKY_SLOPE * h).astype(compute_dtype)
    return jax.nn.sigmoid(jnp.sum(acc, axis=0, keepdims=True)).T          # (B, 1)


# ----------------------------------- test -----------------------------------

if __name__ == "__main__":
    key = jax.random.PRNGKey(0)

    # Small synthetic Criteo-like setup.
    B = 300               # not a multiple of the tile -> exercises padding
    dims = 32             # embedding / hidden dims
    num_dims = 13         # numeric features (I1..I13)
    n_cat = 8             # categorical columns
    vocab = [50, 30, 20, 100, 10, 60, 25, 40]
    d_in = dims + num_dims

    keys = jax.random.split(key, 64)
    ki = iter(keys)

    # Embedding tables (torch.nn.Embedding default: N(0, 1)) -- shared by base & click.
    emb_tables = [jax.random.normal(next(ki), (vocab[i], dims), jnp.float32)
                  for i in range(n_cat)]

    # Linear layers, stored as (in, out). Layer 0: d_in -> dims; rest: dims -> dims.
    def make_layers():
        ws, bs = [], []
        for e in range(DEPTH):
            fan_in = d_in if e == 0 else dims
            s = 1.0 / jnp.sqrt(fan_in)
            ws.append(jax.random.uniform(next(ki), (fan_in, dims), jnp.float32, -s, s))
            bs.append(jax.random.uniform(next(ki), (dims,), jnp.float32, -s, s))
        return ws, bs

    base_ws, base_bs = make_layers()
    click_ws, click_bs = make_layers()

    multi = jax.random.normal(next(ki), (1, 1), jnp.float32)
    att = jax.random.normal(next(ki), (DEPTH, 1), jnp.float32)

    # Inputs: one int index per categorical column, plus numeric features.
    cats = jnp.stack([jax.random.randint(next(ki), (B,), 0, vocab[i], jnp.int32)
                      for i in range(n_cat)], axis=0)                    # (n_cat, B)
    nums = jax.random.normal(next(ki), (B, num_dims), jnp.float32)

    fwd = jax.jit(lambda c, n: deepmf_forward(c, n, emb_tables, base_ws, base_bs,
                                              click_ws, click_bs, multi, att,
                                              block_b=4096))
    out = jax.block_until_ready(fwd(cats, nums))
    assert out.shape == (B, 1)

    # Structural check: plain-JAX mirror of the kernel math (same packing / precision).
    ref_m = reference_forward_matched(cats, nums, emb_tables, base_ws, base_bs,
                                      click_ws, click_bs, multi, att)
    assert jnp.allclose(out, ref_m, atol=2e-3, rtol=2e-3), \
        float(jnp.max(jnp.abs(out - ref_m)))

    # Precision check vs the exact f32 eval-mode semantics of the PyTorch module
    # (residual gap is the intentional bf16-MXU operand rounding).
    x0 = jnp.concatenate([embed_mean(emb_tables, cats), nums], axis=1)
    ref_f32 = reference_forward_f32(x0, base_ws, base_bs, click_ws, click_bs, multi, att)
    assert jnp.allclose(out, ref_f32, atol=2e-2, rtol=2e-2), \
        float(jnp.max(jnp.abs(out - ref_f32)))

    print("KERNEL_OK")
</pallas_src>

<mosaic_0001>
module attributes {stable_mosaic.version = 11 : i64} {
  func.func @deepmf_kernel(%arg0: i32, %arg1: memref<3xf32, #tpu.memory_space<smem>>, %arg2: memref<48x384xbf16, #tpu.memory_space<vmem>>, %arg3: memref<64x48xbf16, #tpu.memory_space<vmem>>, %arg4: memref<64x1xf32, #tpu.memory_space<vmem>>, %arg5: memref<64x64xbf16, #tpu.memory_space<vmem>>, %arg6: memref<64x1xf32, #tpu.memory_space<vmem>>, %arg7: memref<64x64xbf16, #tpu.memory_space<vmem>>, %arg8: memref<64x1xf32, #tpu.memory_space<vmem>>, %arg9: memref<1x384xf32, #tpu.memory_space<vmem>>) attributes {dimension_semantics = [#tpu.dimension_semantics<parallel>], iteration_bounds = array<i64: 1>, scalar_prefetch = 1 : i64, scratch_operands = 0 : i64, tpu.core_type = #tpu.core_type<tc>, window_params = [{transform_indices = @transform_0, window_bounds = array<i64: 48, 384>}, {pipeline_mode = #tpu.pipeline_mode<synchronous>, transform_indices = @transform_1, window_bounds = array<i64: 64, 48>}, {pipeline_mode = #tpu.pipeline_mode<synchronous>, transform_indices = @transform_2, window_bounds = array<i64: 64, 1>}, {pipeline_mode = #tpu.pipeline_mode<synchronous>, transform_indices = @transform_3, window_bounds = array<i64: 64, 64>}, {pipeline_mode = #tpu.pipeline_mode<synchronous>, transform_indices = @transform_4, window_bounds = array<i64: 64, 1>}, {pipeline_mode = #tpu.pipeline_mode<synchronous>, transform_indices = @transform_5, window_bounds = array<i64: 64, 64>}, {pipeline_mode = #tpu.pipeline_mode<synchronous>, transform_indices = @transform_6, window_bounds = array<i64: 64, 1>}, {transform_indices = @transform_7, window_bounds = array<i64: 1, 384>}]} {
    %c0 = arith.constant 0 : index
    %c0_0 = arith.constant 0 : index
    %0 = vector.load %arg3[%c0, %c0_0] : memref<64x48xbf16, #tpu.memory_space<vmem>>, vector<64x48xbf16>
    %c0_1 = arith.constant 0 : index
    %c0_2 = arith.constant 0 : index
    %1 = vector.load %arg2[%c0_1, %c0_2] : memref<48x384xbf16, #tpu.memory_space<vmem>>, vector<48x384xbf16>
    %cst = arith.constant dense<0.000000e+00> : vector<64x384xf32>
    %2 = tpu.matmul %0, %1, %cst {dimension_numbers = #tpu.dot_dimension_numbers<[1], [0], [0], [1], [0, 0, 1, 1], [], []>} : vector<64x48xbf16>, vector<48x384xbf16>, vector<64x384xf32> -> vector<64x384xf32>
    %c0_3 = arith.constant 0 : index
    %c0_4 = arith.constant 0 : index
    %3 = vector.load %arg4[%c0_3, %c0_4] : memref<64x1xf32, #tpu.memory_space<vmem>>, vector<64x1xf32>
    %4 = vector.broadcast %3 : vector<64x1xf32> to vector<64x384xf32>
    %5 = arith.addf %2, %4 : vector<64x384xf32>
    %6 = vector.extract_strided_slice %5 {offsets = [0, 0], sizes = [32, 384], strides = [1, 1]} : vector<64x384xf32> to vector<32x384xf32>
    %7 = vector.extract_strided_slice %5 {offsets = [32, 0], sizes = [32, 384], strides = [1, 1]} : vector<64x384xf32> to vector<32x384xf32>
    %c0_5 = arith.constant 0 : index
    %8 = memref.load %arg1[%c0_5] : memref<3xf32, #tpu.memory_space<smem>>
    %9 = arith.mulf %6, %7 : vector<32x384xf32>
    %10 = vector.broadcast %8 : f32 to vector<32x384xf32>
    %11 = arith.mulf %10, %9 : vector<32x384xf32>
    %cst_6 = arith.constant 0.000000e+00 : f32
    %12 = vector.broadcast %cst_6 : f32 to vector<64x384xf32>
    %13 = arith.cmpf ogt, %5, %12 : vector<64x384xf32>
    %cst_7 = arith.constant 0.00999999977 : f32
    %14 = vector.broadcast %cst_7 : f32 to vector<64x384xf32>
    %15 = arith.mulf %14, %5 : vector<64x384xf32>
    %16 = arith.select %13, %5, %15 : vector<64x384xi1>, vector<64x384xf32>
    %17 = arith.truncf %16 : vector<64x384xf32> to vector<64x384xbf16>
    %c0_8 = arith.constant 0 : index
    %c0_9 = arith.constant 0 : index
    %18 = vector.load %arg5[%c0_8, %c0_9] : memref<64x64xbf16, #tpu.memory_space<vmem>>, vector<64x64xbf16>
    %cst_10 = arith.constant dense<0.000000e+00> : vector<64x384xf32>
    %19 = tpu.matmul %18, %17, %cst_10 {dimension_numbers = #tpu.dot_dimension_numbers<[1], [0], [0], [1], [0, 0, 1, 1], [], []>} : vector<64x64xbf16>, vector<64x384xbf16>, vector<64x384xf32> -> vector<64x384xf32>
    %c0_11 = arith.constant 0 : index
    %c0_12 = arith.constant 0 : index
    %20 = vector.load %arg6[%c0_11, %c0_12] : memref<64x1xf32, #tpu.memory_space<vmem>>, vector<64x1xf32>
    %21 = vector.broadcast %20 : vector<64x1xf32> to vector<64x384xf32>
    %22 = arith.addf %19, %21 : vector<64x384xf32>
    %23 = vector.extract_strided_slice %22 {offsets = [0, 0], sizes = [32, 384], strides = [1, 1]} : vector<64x384xf32> to vector<32x384xf32>
    %24 = vector.extract_strided_slice %22 {offsets = [32, 0], sizes = [32, 384], strides = [1, 1]} : vector<64x384xf32> to vector<32x384xf32>
    %c1 = arith.constant 1 : index
    %25 = memref.load %arg1[%c1] : memref<3xf32, #tpu.memory_space<smem>>
    %26 = arith.mulf %23, %24 : vector<32x384xf32>
    %27 = vector.broadcast %25 : f32 to vector<32x384xf32>
    %28 = arith.mulf %27, %26 : vector<32x384xf32>
    %29 = arith.addf %11, %28 : vector<32x384xf32>
    %cst_13 = arith.constant 0.000000e+00 : f32
    %30 = vector.broadcast %cst_13 : f32 to vector<64x384xf32>
    %31 = arith.cmpf ogt, %22, %30 : vector<64x384xf32>
    %cst_14 = arith.constant 0.00999999977 : f32
    %32 = vector.broadcast %cst_14 : f32 to vector<64x384xf32>
    %33 = arith.mulf %32, %22 : vector<64x384xf32>
    %34 = arith.select %31, %22, %33 : vector<64x384xi1>, vector<64x384xf32>
    %35 = arith.truncf %34 : vector<64x384xf32> to vector<64x384xbf16>
    %c0_15 = arith.constant 0 : index
    %c0_16 = arith.constant 0 : index
    %36 = vector.load %arg7[%c0_15, %c0_16] : memref<64x64xbf16, #tpu.memory_space<vmem>>, vector<64x64xbf16>
    %cst_17 = arith.constant dense<0.000000e+00> : vector<64x384xf32>
    %37 = tpu.matmul %36, %35, %cst_17 {dimension_numbers = #tpu.dot_dimension_numbers<[1], [0], [0], [1], [0, 0, 1, 1], [], []>} : vector<64x64xbf16>, vector<64x384xbf16>, vector<64x384xf32> -> vector<64x384xf32>
    %c0_18 = arith.constant 0 : index
    %c0_19 = arith.constant 0 : index
    %38 = vector.load %arg8[%c0_18, %c0_19] : memref<64x1xf32, #tpu.memory_space<vmem>>, vector<64x1xf32>
    %39 = vector.broadcast %38 : vector<64x1xf32> to vector<64x384xf32>
    %40 = arith.addf %37, %39 : vector<64x384xf32>
    %41 = vector.extract_strided_slice %40 {offsets = [0, 0], sizes = [32, 384], strides = [1, 1]} : vector<64x384xf32> to vector<32x384xf32>
    %42 = vector.extract_strided_slice %40 {offsets = [32, 0], sizes = [32, 384], strides = [1, 1]} : vector<64x384xf32> to vector<32x384xf32>
    %43 = arith.mulf %41, %42 : vector<32x384xf32>
    %44 = arith.addf %29, %43 : vector<32x384xf32>
    %cst_20 = arith.constant dense<0.000000e+00> : vector<384xf32>
    %45 = vector.multi_reduction <add>, %44, %cst_20 [0] : vector<32x384xf32> to vector<384xf32>
    %46 = vector.shape_cast %45 : vector<384xf32> to vector<1x384xf32>
    %47 = arith.negf %46 : vector<1x384xf32>
    %48 = math.exp %47 : vector<1x384xf32>
    %cst_21 = arith.constant 1.000000e+00 : f32
    %49 = vector.broadcast %cst_21 : f32 to vector<1x384xf32>
    %50 = arith.addf %49, %48 : vector<1x384xf32>
    %51 = arith.divf %49, %50 : vector<1x384xf32>
    %c0_22 = arith.constant 0 : index
    %c0_23 = arith.constant 0 : index
    %52 = vector.load %arg9[%c0_22, %c0_23] : memref<1x384xf32, #tpu.memory_space<vmem>>, vector<1x384xf32>
    tpu.vector_store %arg9[%c0_22, %c0_23], %51 {strides = array<i32>} : memref<1x384xf32, #tpu.memory_space<vmem>>, vector<1x384xf32>,
    return
  }
  func.func @transform_0(%arg0: i32, %arg1: memref<3xf32, #tpu.memory_space<smem>>) -> (i32, i32) {
    %c0_i32 = arith.constant 0 : i32
    %c0_i32_0 = arith.constant 0 : i32
    return %c0_i32, %arg0 : i32, i32
  }
  func.func @transform_1(%arg0: i32, %arg1: memref<3xf32, #tpu.memory_space<smem>>) -> (i32, i32) {
    %c0_i32 = arith.constant 0 : i32
    %c0_i32_0 = arith.constant 0 : i32
    %c0_i32_1 = arith.constant 0 : i32
    return %c0_i32, %c0_i32_0 : i32, i32
  }
  func.func @transform_2(%arg0: i32, %arg1: memref<3xf32, #tpu.memory_space<smem>>) -> (i32, i32) {
    %c0_i32 = arith.constant 0 : i32
    %c0_i32_0 = arith.constant 0 : i32
    %c0_i32_1 = arith.constant 0 : i32
    return %c0_i32, %c0_i32_0 : i32, i32
  }
  func.func @transform_3(%arg0: i32, %arg1: memref<3xf32, #tpu.memory_space<smem>>) -> (i32, i32) {
    %c0_i32 = arith.constant 0 : i32
    %c0_i32_0 = arith.constant 0 : i32
    %c0_i32_1 = arith.constant 0 : i32
    return %c0_i32, %c0_i32_0 : i32, i32
  }
  func.func @transform_4(%arg0: i32, %arg1: memref<3xf32, #tpu.memory_space<smem>>) -> (i32, i32) {
    %c0_i32 = arith.constant 0 : i32
    %c0_i32_0 = arith.constant 0 : i32
    %c0_i32_1 = arith.constant 0 : i32
    return %c0_i32, %c0_i32_0 : i32, i32
  }
  func.func @transform_5(%arg0: i32, %arg1: memref<3xf32, #tpu.memory_space<smem>>) -> (i32, i32) {
    %c0_i32 = arith.constant 0 : i32
    %c0_i32_0 = arith.constant 0 : i32
    %c0_i32_1 = arith.constant 0 : i32
    return %c0_i32, %c0_i32_0 : i32, i32
  }
  func.func @transform_6(%arg0: i32, %arg1: memref<3xf32, #tpu.memory_space<smem>>) -> (i32, i32) {
    %c0_i32 = arith.constant 0 : i32
    %c0_i32_0 = arith.constant 0 : i32
    %c0_i32_1 = arith.constant 0 : i32
    return %c0_i32, %c0_i32_0 : i32, i32
  }
  func.func @transform_7(%arg0: i32, %arg1: memref<3xf32, #tpu.memory_space<smem>>) -> (i32, i32) {
    %c0_i32 = arith.constant 0 : i32
    %c0_i32_0 = arith.constant 0 : i32
    return %c0_i32, %arg0 : i32, i32
  }
}

</mosaic_0001>

<bundles_post_ra>
// kernel: _lambda_.1
= control target key start
LH: loop header
LB: loop body
LE: loop exit
PB: predicated region body
PF: predicated region fallthrough
CT: control target
= control target key end

     0   :  { %s1885_s0 = inlined_call_operand.vmem [shape: f32[3], index: 0, kind: input, shape index: {}]   ;;  %s1886_s1 = inlined_call_operand.vmem [shape: bf16[48,384], index: 1, kind: input, shape index: {}]   ;;  %s1887_s2 = inlined_call_operand.vmem [shape: bf16[64,48], index: 2, kind: input, shape index: {}]   ;;  %s1888_s3 = inlined_call_operand.vmem [shape: f32[64,1], index: 3, kind: input, shape index: {}]   ;;  %s1889_s4 = inlined_call_operand.vmem [shape: bf16[64,64], index: 4, kind: input, shape index: {}]   ;;  %s1890_s5 = inlined_call_operand.vmem [shape: f32[64,1], index: 5, kind: input, shape index: {}]   ;;  %s1891_s6 = inlined_call_operand.vmem [shape: bf16[64,64], index: 6, kind: input, shape index: {}]   ;;  %s1892_s7 = inlined_call_operand.vmem [shape: f32[64,1], index: 7, kind: input, shape index: {}]   ;;  %s1893_s8 = inlined_call_operand.vmem [shape: f32[1,384], index: 8, kind: output, shape index: {}]  }
   0x1   :  { %s13_s29 = sshll.u32 %s1885_s0, 4  ;;  %s14_s29 = int_to_ptr.vmem [resolvable:$true] %s13_s29 }
   0x2   :  { %s1270_s30 = scalar_lea.vmem %s14_s29, 16  ;;  %p1275_p1 = scmp.lt.s32.totalorder %s14_s29, %s14_s29 }
   0x3   :  { %p1271_p0 = scmp.ne.s32.totalorder %s14_s29, %s1270_s30  ;;  %p1276_p2 = scmp.lt.s32.totalorder %s1270_s30, %s1270_s30 }
   0x5   :  { %p1277_p3 = por %p1276_p2, %p1275_p1 }
   0x7   :  { %p1278_p4 = pnand %p1277_p3, %p1271_p0 }
   0x9   :  { %1281 = shalt.err (!%p1278_p4)  }
   0xa   :  { %s1284_s9 = smov [#allocation3]  }
   0xb   :  { %16 = dma.vmem_to_smem %s14_s29, 16, %s1284_s9, [#allocation2] }
   0xc   :  { %1282 = dma.done.wait [#allocation2], 16 }
   0xd   :  { %1283 = vsyncadd [#allocation2], 4294967280 }
   0xe   :  { %18 = sfence }
   0xf   :  { %v1234_v0 = vld [vmem:[%s1886_s1 + $0x4] ss:$12 sps:$4 sm:$0xff]   ;;  %v1236_v1 = vld [vmem:[%s1886_s1 + $0x8] ss:$12 sps:$4 sm:$0xff]   ;;  %v1285_v2 = vmov 0   ;;  %vm170_vm0 = vcmask 392192  }
  0x10   :  { %215 = vmatprep.mubr.bf16.mxu0 %v1285_v2  ;;  %1232 = vset.pattern.permute.xlu0 %v1285_v2  ;;  %v1237_v3 = vld [vmem:[%s1886_s1] ss:$12 sps:$4 sm:$0xff]   ;;  %v1238_v4 = vld [vmem:[%s1886_s1 + $0x1c] ss:$12 sps:$4 sm:$0xff]   ;;  %v1241_v6 = vld [vmem:[%s1886_s1 + $0x18] ss:$12 sps:$4 sm:$0xff]  }
  0x11   :  { %183 = vmatprep.subr.bf16.mxu0 %v1234_v0  ;;  %1233 = vset.pattern.permute.xlu1 %v1285_v2  ;;  %v1240_v5 = vld [vmem:[%s1886_s1 + $0x20] ss:$12 sps:$4 sm:$0xff]   ;;  %v1244_v8 = vld [vmem:[%s1886_s1 + $0x38] ss:$12 sps:$4 sm:$0xff]   ;;  %v1245_v10 = vld [vmem:[%s1886_s1 + $0x30] ss:$12 sps:$4 sm:$0xff]  }
  0x12   :  { %1183 = vmatprep.subr.bf16.mxu1 %v1236_v1  ;;  %184 = vmatpush1.bf16.msra.mxu0 %v1237_v3  ;;  %v1242_v7 = vld [vmem:[%s1886_s1 + $0x34] ss:$12 sps:$4 sm:$0xff]   ;;  %v1247_v11 = vld [vmem:[%s1887_s2 + $0x8] sm:$0xff]   ;;  %v57_v16 = vld [vmem:[%s1888_s3 + $0x18] sm:$0xff]  ;;  %vm507_vm1 = vcmask 523264   ;;  %s321_s14 = sld [smem:[#allocation3]] }
  0x13   :  { %1184 = vmatpush3.bf16.msra.mxu1 %v1236_v1  ;;  %185 = vmatprep.subr.bf16.mxu0 %v1238_v4  ;;  %v1246_v9 = vld [vmem:[%s1887_s2] sm:$0xff]   ;;  %v56_v13 = vld [vmem:[%s1888_s3 + $0x10] sm:$0xff]  ;;  %v55_v15 = vld [vmem:[%s1888_s3 + $0x8] sm:$0xff]  ;;  %s1634_s15 = sld [smem:[#allocation3 + $0x1]] }
  0x14   :  { %1185 = vmatprep.subr.bf16.mxu1 %v1240_v5  ;;  %1189 = vmatprep.mubr.msk.bf16.mxu1 %vm170_vm0, %v1246_v9  ;;  %v54_v12 = vld [vmem:[%s1888_s3] sm:$0xff]  ;;  %v1248_v14 = vld [vmem:[%s1887_s2 + $0x10] sm:$0xff]   ;;  %v1249_v17 = vld [vmem:[%s1887_s2 + $0x18] sm:$0xff]  }
  0x15   :  { %64 = vperm.xlu0 %1232, %v54_v12   ;;  %74 = vperm.xlu1 %1233, %v56_v13   ;;  %v58_v18 = vld [vmem:[%s1888_s3 + $0x20] sm:$0xff]  ;;  %v59_v19 = vld [vmem:[%s1888_s3 + $0x28] sm:$0xff]  ;;  %v60_v20 = vld [vmem:[%s1888_s3 + $0x30] sm:$0xff] }
  0x16   :  { %186 = vmatpush1.bf16.msra.mxu0 %v1241_v6  ;;  %v61_v21 = vld [vmem:[%s1888_s3 + $0x38] sm:$0xff]  ;;  %v439_v22 = vld [vmem:[%s1890_s5] sm:$0xff]  ;;  %v440_v23 = vld [vmem:[%s1890_s5 + $0x8] sm:$0xff] }
  0x17   :  { %1186 = vmatpush3.bf16.msra.mxu1 %v1240_v5  ;;  %187 = vmatprep.subr.bf16.mxu0 %v1242_v7  ;;  %v441_v24 = vld [vmem:[%s1890_s5 + $0x10] sm:$0xff]  ;;  %v442_v25 = vld [vmem:[%s1890_s5 + $0x18] sm:$0xff]  ;;  %v443_v26 = vld [vmem:[%s1890_s5 + $0x20] sm:$0xff] }
  0x18   :  { %1187 = vmatprep.subr.bf16.mxu1 %v1244_v8  ;;  %v444_v27 = vld [vmem:[%s1890_s5 + $0x28] sm:$0xff]  ;;  %v445_v28 = vld [vmem:[%s1890_s5 + $0x30] sm:$0xff]  ;;  %v446_v29 = vld [vmem:[%s1890_s5 + $0x38] sm:$0xff] }
  0x19   :  { %69 = vperm.xlu0 %1232, %v55_v15   ;;  %79 = vperm.xlu1 %1233, %v57_v16   ;;  %v788_v30 = vld [vmem:[%s1892_s7] sm:$0xff]  ;;  %v789_v31 = vld [vmem:[%s1892_s7 + $0x8] sm:$0xff]  ;;  %v790_v34 = vld [vmem:[%s1892_s7 + $0x10] sm:$0xff] }
  0x1a   :  { %188 = vmatpush1.bf16.msra.mxu0 %v1245_v10  ;;  %v792_v32 = vld [vmem:[%s1892_s7 + $0x20] sm:$0xff]  ;;  %v793_v33 = vld [vmem:[%s1892_s7 + $0x28] sm:$0xff]  ;;  %v794_v35 = vld [vmem:[%s1892_s7 + $0x30] sm:$0xff] }
  0x1b   :  { %1188 = vmatpush3.bf16.msra.mxu1 %v1244_v8  ;;  %v791_v36 = vld [vmem:[%s1892_s7 + $0x18] sm:$0xff]  ;;  %v1464_v38 = vld [vmem:[%s1889_s4] sm:$0xff]  }
  0x1c   :  { %v795_v37 = vld [vmem:[%s1892_s7 + $0x38] sm:$0xff] }
  0x1d   :  { %1124 = vmatmul.mubr.msk.bf16.vlgmr.msra.gmra.mrb[0].mxu0 %vm170_vm0, %v1246_v9  ;;  %84 = vperm.xlu0 %1232, %v58_v18  }
  0x1e   :  { %1190 = vmatmul.mubr.msk.bf16.vlgmr.msra.gmra.mrb[0].mxu1 %vm170_vm0, %v1247_v11  ;;  %225 = vmatprep.mubr.bf16.mxu0 %v1285_v2 }
  0x1f   :  { %1193 = vmatprep.mubr.msk.bf16.mxu1 %vm170_vm0, %v1248_v14  ;;  %89 = vperm.xlu1 %1233, %v59_v19  }
  0x21   :  { %94 = vperm.xlu0 %1232, %v60_v20  }
  0x23   :  { %99 = vperm.xlu1 %1233, %v61_v21  }
  0x25   :  { %1125 = vmatmul.mubr.msk.bf16.gmra.mrb[4].mxu0 %vm170_vm0, %v1247_v11  ;;  %449 = vperm.xlu0 %1232, %v439_v22  }
  0x26   :  { %1194 = vmatmul.mubr.msk.bf16.gmra.mrb[4].mxu1 %vm170_vm0, %v1249_v17  ;;  %235 = vmatprep.mubr.bf16.mxu0 %v1285_v2 }
  0x27   :  { %552 = vmatprep.mubr.bf16.mxu1 %v1285_v2  ;;  %454 = vperm.xlu1 %1233, %v440_v23  }
  0x29   :  { %459 = vperm.xlu0 %1232, %v441_v24  }
  0x2b   :  { %464 = vperm.xlu1 %1233, %v442_v25  }
  0x2d   :  { %1126 = vmatmul.mubr.msk.bf16.gmra.mrb[8].mxu0 %vm170_vm0, %v1248_v14  ;;  %469 = vperm.xlu0 %1232, %v443_v26  }
  0x2e   :  { %245 = vmatprep.mubr.bf16.mxu0 %v1285_v2 }
  0x2f   :  { %474 = vperm.xlu1 %1233, %v444_v27  }
  0x31   :  { %479 = vperm.xlu0 %1232, %v445_v28  }
  0x33   :  { %484 = vperm.xlu1 %1233, %v446_v29  }
  0x35   :  { %1127 = vmatmul.mubr.msk.bf16.gmra.mrb[12].mxu0 %vm170_vm0, %v1249_v17  ;;  %798 = vperm.xlu0 %1232, %v788_v30  }
  0x36   :  { %1205 = vmatprep.mubr.msk.bf16.mxu0 %vm507_vm1, %v1464_v38 }
  0x37   :  { %803 = vperm.xlu1 %1233, %v789_v31  }
  0x39   :  { %818 = vperm.xlu0 %1232, %v792_v32  }
  0x3b   :  { %823 = vperm.xlu1 %1233, %v793_v33  }
  0x3d   :  { %808 = vperm.xlu0 %1232, %v790_v34  }
  0x3f   :  { %828 = vperm.xlu1 %1233, %v794_v35  }
  0x41   :  { %813 = vperm.xlu0 %1232, %v791_v36  }
  0x43   :  { %833 = vperm.xlu1 %1233, %v795_v37  }
  0x94   :  { %v65_v39 = vpop.permute.xlu0 %64  ;;  %v75_v40 = vpop.permute.xlu1 %74 }
  0x98   :  { %v70_v41 = vpop.permute.xlu0 %69  ;;  %v1468_v42 = vpop.permute.xlu1 %79 }
  0x9c   :  { %v1470_v43 = vpop.permute.xlu0 %84 }
  0x9e   :  { %v1490_v1 = vpop.permute.xlu1 %89 }
  0xa0   :  { %v1495_v6 = vpop.permute.xlu0 %94 }
  0xa2   :  { %v1522_v30 = vpop.permute.xlu1 %99 }
  0xf0   :  { %v217_v44 = vpop.f32.mrb[0].mxu0 }
  0xf1   :  { %v1191_v45 = vpop.f32.mrb[0].mxu1  ;;  %v1472_v46 = vadd.f32 %v217_v44, %v65_v39  ;;  %v219_v48 = vpop.f32.mrb[1].mxu0 }
  0xf2   :  { %v1474_v47 = vadd.f32 %v1191_v45, %v75_v40  ;;  %v290_v49 = vpop.f32.mrb[1].mxu1  ;;  %v1476_v50 = vadd.f32 %v219_v48, %v65_v39  ;;  %v221_v52 = vpop.f32.mrb[2].mxu0 }
  0xf3   :  { %v291_v51 = vadd.f32 %v290_v49, %v65_v39  ;;  %v1192_v53 = vpop.f32.mrb[2].mxu1  ;;  %vm347_vm2 = vcmp.gt.f32.partialorder %v1472_v46, 0.0  ;;  %v371_v54 = vmul.f32 0.01, %v1472_v46  ;;  %v1481_v56 = vadd.f32 %v221_v52, %v70_v41  ;;  %v223_v57 = vpop.f32.mrb[3].mxu0 }
  0xf4   :  { %v379_v55 = vmul.f32 0.01, %v1474_v47  ;;  %v372_v58 = vmul.f32 0.01, %v1476_v50  ;;  %v302_v60 = vadd.f32 %v1192_v53, %v1468_v42  ;;  %v1485_v61 = vadd.f32 %v223_v57, %v70_v41  ;;  %v293_v62 = vpop.f32.mrb[3].mxu1 }
  0xf5   :  { %v373_v59 = vmul.f32 0.01, %v291_v51  ;;  %vm350_vm3 = vcmp.gt.f32.partialorder %v1481_v56, 0.0  ;;  %v374_v63 = vmul.f32 0.01, %v1481_v56  ;;  %v294_v0 = vadd.f32 %v293_v62, %v70_v41 }
  0xf6   :  { %vm348_vm4 = vcmp.gt.f32.partialorder %v1476_v50, 0.0  ;;  %v382_v3 = vmul.f32 0.01, %v302_v60  ;;  %v375_v4 = vmul.f32 0.01, %v1485_v61  ;;  %vm351_vm5 = vcmp.gt.f32.partialorder %v1485_v61, 0.0 }
  0xf7   :  { %v396_v5 = vsel %vm348_vm4, %v1476_v50, %v372_v58  ;;  %v376_v7 = vmul.f32 0.01, %v294_v0  ;;  %vm349_vm6 = vcmp.gt.f32.partialorder %v291_v51, 0.0  ;;  %vm352_vm7 = vcmp.gt.f32.partialorder %v294_v0, 0.0 }
  0xf8   :  { %v395_v8 = vsel %vm347_vm2, %v1472_v46, %v371_v54  ;;  %v227_v9 = vpop.f32.mrb[4].mxu0  ;;  %v399_v11 = vsel %vm351_vm5, %v1485_v61, %v375_v4  ;;  %v397_v12 = vsel %vm349_vm6, %v291_v51, %v373_v59  ;;  %v398_v13 = vsel %vm350_vm3, %v1481_v56, %v374_v63 }
  0xf9   :  { %v1195_v10 = vpop.f32.mrb[4].mxu1  ;;  %vm355_vm8 = vcmp.gt.f32.partialorder %v1474_v47, 0.0  ;;  %v1505_v14 = vadd.f32 %v227_v9, %v75_v40  ;;  %v229_v16 = vpop.f32.mrb[5].mxu0  ;;  %v420_v18 = vpack.c.bf16 %v399_v11, %v396_v5  ;;  %v400_v19 = vsel %vm352_vm7, %v294_v0, %v376_v7 }
  0xfa   :  { %v1508_v15 = vadd.f32 %v1195_v10, %v1495_v6  ;;  %v306_v17 = vpop.f32.mrb[5].mxu1  ;;  %v1510_v20 = vadd.f32 %v229_v16, %v75_v40  ;;  %v231_v22 = vpop.f32.mrb[6].mxu0  ;;  %v421_v24 = vpack.c.bf16 %v400_v19, %v397_v12  ;;  %v419_v25 = vpack.c.bf16 %v398_v13, %v395_v8 }
  0xfb   :  { %v307_v21 = vadd.f32 %v306_v17, %v1470_v43  ;;  %v1196_v23 = vpop.f32.mrb[6].mxu1  ;;  %vm353_vm9 = vcmp.gt.f32.partialorder %v1505_v14, 0.0  ;;  %v377_v26 = vmul.f32 0.01, %v1505_v14  ;;  %v233_v29 = vpop.f32.mrb[7].mxu0  ;;  %520 = vmatprep.subr.bf16.mxu1 %v420_v18  ;;  %v1528_v34 = vadd.f32 %v231_v22, %v1468_v42 }
  0xfc   :  { %v1517_v27 = vmul.f32 %v1508_v15, %v1474_v47  ;;  %v1520_v28 = vmul.f32 0.01, %v1508_v15  ;;  %v378_v31 = vmul.f32 0.01, %v1510_v20  ;;  %v309_v35 = vpop.f32.mrb[7].mxu1  ;;  %1197 = vmatprep.subr.bf16.mxu0 %v421_v24  ;;  %521 = vmatpush1.bf16.msra.mxu1 %v419_v25  ;;  %v318_v36 = vadd.f32 %v1196_v23, %v1522_v30 }
  0xfd   :  { %v1525_v32 = vmul.f32 %v307_v21, %v291_v51  ;;  %v385_v33 = vmul.f32 0.01, %v307_v21  ;;  %v1532_v37 = vadd.f32 %v233_v29, %v1468_v42  ;;  %v310_v39 = vadd.f32 %v309_v35, %v1490_v1  ;;  %1198 = vmatpush3.bf16.msra.mxu0 %v421_v24  ;;  %v1251_v35 = vld [vmem:[%s1889_s4 + $0x8] sm:$0xff]  }
  0xfe   :  { %vm358_vm10 = vcmp.gt.f32.partialorder %v302_v60, 0.0  ;;  %vm356_vm11 = vcmp.gt.f32.partialorder %v1528_v34, 0.0  ;;  %v380_v40 = vmul.f32 0.01, %v1528_v34  ;;  %v403_v41 = vsel %vm355_vm8, %v1474_v47, %v379_v55 }
  0xff   :  { %v406_v44 = vsel %vm358_vm10, %v302_v60, %v382_v3  ;;  %v1540_v45 = vmul.f32 %v318_v36, %v302_v60  ;;  %v394_v48 = vmul.f32 0.01, %v318_v36  ;;  %v381_v49 = vmul.f32 0.01, %v1532_v37 }
 0x100   :  { %v1543_v42 = vmul.f32 %v310_v39, %v294_v0  ;;  %v388_v51 = vmul.f32 0.01, %v310_v39  ;;  %v424_v52 = vpack.c.bf16 %v406_v44, %v403_v41  ;;  %v237_v53 = vpop.f32.mrb[8].mxu0  ;;  %vm354_vm12 = vcmp.gt.f32.partialorder %v1510_v20, 0.0 }
 0x101   :  { %vm357_vm13 = vcmp.gt.f32.partialorder %v1532_v37, 0.0  ;;  %v238_v54 = vadd.f32 %v237_v53, %v1470_v43  ;;  %v239_v57 = vpop.f32.mrb[9].mxu0  ;;  %v402_v47 = vsel %vm354_vm12, %v1510_v20, %v378_v31  ;;  %vm361_vm14 = vcmp.gt.f32.partialorder %v307_v21, 0.0 }
 0x102   :  { %v405_v55 = vsel %vm357_vm13, %v1532_v37, %v381_v49  ;;  %1199 = vmatprep.subr.bf16.mxu0 %v424_v52  ;;  %v240_v58 = vadd.f32 %v239_v57, %v1470_v43  ;;  %v241_v59 = vpop.f32.mrb[10].mxu0  ;;  %vm364_vm15 = vcmp.gt.f32.partialorder %v310_v39, 0.0  ;;  %v409_v62 = vsel %vm361_vm14, %v307_v21, %v385_v33  ;;  %v1621_v57 = vpop.permute.xlu1 %454 }
 0x103   :  { %v423_v60 = vpack.c.bf16 %v405_v55, %v402_v47  ;;  %v1552_v63 = vmul.f32 %v238_v54, %v1472_v46  ;;  %vm359_vm0 = vcmp.gt.f32.partialorder %v238_v54, 0.0  ;;  %v383_v0 = vmul.f32 0.01, %v238_v54  ;;  %1200 = vmatpush3.bf16.msra.mxu0 %v424_v52  ;;  %v243_v4 = vpop.f32.mrb[11].mxu0 }
 0x104   :  { %v242_v3 = vadd.f32 %v241_v59, %v1490_v1  ;;  %v1556_v5 = vmul.f32 %v240_v58, %v1476_v50  ;;  %v384_v7 = vmul.f32 0.01, %v240_v58  ;;  %v244_v8 = vadd.f32 %v243_v4, %v1490_v1 }
 0x105   :  { %522 = vmatprep.subr.bf16.mxu1 %v423_v60  ;;  %v412_v43 = vsel %vm364_vm15, %v310_v39, %v388_v51  ;;  %v401_v50 = vsel %vm353_vm9, %v1505_v14, %v377_v26  ;;  %v404_v1 = vsel %vm356_vm11, %v1528_v34, %v380_v40  ;;  %vm367_vm3 = vcmp.gt.f32.partialorder %v1508_v15, 0.0 }
 0x106   :  { %v1560_v9 = vmul.f32 %v242_v3, %v1481_v56  ;;  %vm362_vm2 = vcmp.gt.f32.partialorder %v242_v3, 0.0  ;;  %v386_v46 = vmul.f32 0.01, %v242_v3  ;;  %v427_v10 = vpack.c.bf16 %v412_v43, %v409_v62  ;;  %v1625_v55 = vpop.permute.xlu1 %464 }
 0x107   :  { %v1563_v11 = vmul.f32 %v244_v8, %v1485_v61  ;;  %v387_v12 = vmul.f32 0.01, %v244_v8  ;;  %v422_v13 = vpack.c.bf16 %v404_v1, %v401_v50  ;;  %vm370_vm4 = vcmp.gt.f32.partialorder %v318_v36, 0.0 }
 0x108   :  { %1201 = vmatprep.subr.bf16.mxu0 %v427_v10  ;;  %vm360_vm5 = vcmp.gt.f32.partialorder %v240_v58, 0.0  ;;  %v415_v56 = vsel %vm367_vm3, %v1508_v15, %v1520_v28  ;;  %v418_v61 = vsel %vm370_vm4, %v318_v36, %v394_v48  ;;  %v247_v16 = vpop.f32.mrb[12].mxu0  ;;  %vm363_vm6 = vcmp.gt.f32.partialorder %v244_v8, 0.0 }
 0x109   :  { %1202 = vmatpush3.bf16.msra.mxu0 %v427_v10  ;;  %523 = vmatpush1.bf16.msra.mxu1 %v422_v13  ;;  %v430_v17 = vpack.c.bf16 %v418_v61, %v415_v56  ;;  %v248_v18 = vadd.f32 %v247_v16, %v1495_v6  ;;  %v249_v19 = vpop.f32.mrb[13].mxu0  ;;  %v408_v21 = vsel %vm360_vm5, %v240_v58, %v384_v7  ;;  %v1629_v60 = vstv %s321_s14 }
 0x10a   :  { %v411_v22 = vsel %vm363_vm6, %v244_v8, %v387_v12  ;;  %v250_v23 = vadd.f32 %v249_v19, %v1495_v6  ;;  %v251_v24 = vpop.f32.mrb[14].mxu0  ;;  %v407_v26 = vsel %vm359_vm0, %v238_v54, %v383_v0  ;;  %v410_v29 = vsel %vm362_vm2, %v242_v3, %v386_v46  ;;  %v1617_v54 = vld [vmem:[%s1891_s6] sm:$0xff]   ;;  %v1631_v62 = vpop.permute.xlu1 %474 }
 0x10b   :  { %v426_v25 = vpack.c.bf16 %v411_v22, %v408_v21  ;;  %1203 = vmatprep.subr.bf16.mxu0 %v430_v17  ;;  %v1579_v15 = vmul.f32 %v248_v18, %v1505_v14  ;;  %vm365_vm7 = vcmp.gt.f32.partialorder %v248_v18, 0.0  ;;  %v389_v28 = vmul.f32 0.01, %v248_v18  ;;  %v253_v33 = vpop.f32.mrb[15].mxu0  ;;  %v1252_v14 = vld [vmem:[%s1889_s4 + $0x10] sm:$0xff]  }
 0x10c   :  { %v252_v31 = vadd.f32 %v251_v24, %v1522_v30  ;;  %v1586_v6 = vmul.f32 %v250_v23, %v1510_v20  ;;  %v390_v36 = vmul.f32 0.01, %v250_v23  ;;  %v254_v39 = vadd.f32 %v253_v33, %v1522_v30 }
 0x10d   :  { %1204 = vmatpush3.bf16.msra.mxu0 %v430_v17  ;;  %524 = vmatprep.subr.bf16.mxu1 %v426_v25  ;;  %v425_v40 = vpack.c.bf16 %v410_v29, %v407_v26  ;;  %vm366_vm9 = vcmp.gt.f32.partialorder %v250_v23, 0.0  ;;  %v413_v30 = vsel %vm365_vm7, %v248_v18, %v389_v28  ;;  %v1639_v10 = vmul.f32 %v1629_v60, %v1517_v27 }
 0x10e   :  { %v1593_v41 = vmul.f32 %v252_v31, %v1528_v34  ;;  %vm368_vm8 = vcmp.gt.f32.partialorder %v252_v31, 0.0  ;;  %v392_v44 = vmul.f32 0.01, %v252_v31  ;;  %v1596_v48 = vmul.f32 %v254_v39, %v1532_v37  ;;  %v1253_v37 = vld [vmem:[%s1889_s4 + $0x18] sm:$0xff]  }
 0x10f   :  { %v393_v20 = vmul.f32 0.01, %v254_v39  ;;  %525 = vmatpush1.bf16.msra.mxu1 %v425_v40  ;;  %vm369_vm10 = vcmp.gt.f32.partialorder %v254_v39, 0.0  ;;  %v414_v51 = vsel %vm366_vm9, %v250_v23, %v390_v36  ;;  %v1644_v1 = vmul.f32 %v1629_v60, %v1525_v32  ;;  %v1660_v32 = vpop.permute.xlu1 %484 }
 0x110   :  { %1206 = vmatmul.mubr.msk.bf16.vlgmr.msra.gmra.mrb[16].mxu0 %vm507_vm1, %v1251_v35  ;;  %v416_v49 = vsel %vm368_vm8, %v252_v31, %v392_v44  ;;  %v1648_v56 = vmul.f32 %v1629_v60, %v1540_v45  ;;  %v1652_v27 = vmul.f32 %v1629_v60, %v1543_v42  ;;  %v1656_v16 = vmul.f32 %v1629_v60, %v1552_v63 }
 0x111   :  { %1209 = vmatprep.mubr.msk.bf16.mxu0 %vm507_vm1, %v1252_v14  ;;  %v417_v52 = vsel %vm369_vm10, %v254_v39, %v393_v20  ;;  %v428_v34 = vpack.c.bf16 %v416_v49, %v413_v30  ;;  %v1664_v45 = vmul.f32 %v1629_v60, %v1556_v5  ;;  %v1668_v21 = vmul.f32 %v1629_v60, %v1560_v9 }
 0x112   :  { %v429_v53 = vpack.c.bf16 %v417_v52, %v414_v51  ;;  %v1672_v25 = vmul.f32 %v1629_v60, %v1563_v11  ;;  %v1679_v9 = vmul.f32 %v1629_v60, %v1579_v15  ;;  %v1685_v40 = vstv %s1634_s15 }
 0x113   :  { %v1689_v11 = vmul.f32 %v1629_v60, %v1586_v6 }
 0x114   :  { %526 = vmatprep.subr.bf16.mxu1 %v429_v53 }
 0x115   :  { %527 = vmatpush1.bf16.msra.mxu1 %v428_v34 }
 0x118   :  { %1210 = vmatmul.mubr.msk.bf16.gmra.mrb[20].mxu0 %vm507_vm1, %v1253_v37  ;;  %1136 = vmatmul.mubr.msk.bf16.vlgmr.msra.gmra.mrb[8].mxu1 %vm507_vm1, %v1464_v38  ;;  %v450_v38 = vpop.permute.xlu0 %449 }
 0x119   :  { %562 = vmatprep.mubr.bf16.mxu1 %v1285_v2  ;;  %900 = vmatprep.mubr.bf16.mxu0 %v1285_v2 }
 0x11c   :  { %v1623_v47 = vpop.permute.xlu0 %459 }
 0x120   :  { %1137 = vmatmul.mubr.msk.bf16.gmra.mrb[12].mxu1 %vm507_vm1, %v1251_v35  ;;  %v1627_v58 = vpop.permute.xlu0 %469 }
 0x121   :  { %572 = vmatprep.mubr.bf16.mxu1 %v1285_v2 }
 0x124   :  { %v1658_v17 = vpop.permute.xlu0 %479 }
 0x128   :  { %1138 = vmatmul.mubr.msk.bf16.gmra.mrb[16].mxu1 %vm507_vm1, %v1252_v14 }
 0x129   :  { %582 = vmatprep.mubr.bf16.mxu1 %v1285_v2 }
 0x130   :  { %1139 = vmatmul.mubr.msk.bf16.gmra.mrb[20].mxu1 %vm507_vm1, %v1253_v37 }
 0x131   :  { %1221 = vmatprep.mubr.msk.bf16.mxu1 %vm507_vm1, %v1617_v54 }
 0x1e3   :  { %v1207_v59 = vpop.f32.mrb[16].mxu0 }
 0x1e4   :  { %v636_v0 = vadd.f32 %v1207_v59, %v1623_v47  ;;  %v627_v3 = vpop.f32.mrb[17].mxu0 }
 0x1e5   :  { %v628_v4 = vadd.f32 %v627_v3, %v450_v38  ;;  %v1208_v7 = vpop.f32.mrb[18].mxu0 }
 0x1e6   :  { %v728_v8 = vmul.f32 0.01, %v636_v0  ;;  %v639_v43 = vadd.f32 %v1208_v7, %v1625_v55  ;;  %v630_v46 = vpop.f32.mrb[19].mxu0  ;;  %vm704_vm11 = vcmp.gt.f32.partialorder %v636_v0, 0.0 }
 0x1e7   :  { %v722_v12 = vmul.f32 0.01, %v628_v4  ;;  %v631_v50 = vadd.f32 %v630_v46, %v1621_v57  ;;  %vm698_vm12 = vcmp.gt.f32.partialorder %v628_v4, 0.0 }
 0x1e8   :  { %v731_v13 = vmul.f32 0.01, %v639_v43  ;;  %vm707_vm13 = vcmp.gt.f32.partialorder %v639_v43, 0.0  ;;  %v752_v18 = vsel %vm704_vm11, %v636_v0, %v728_v8 }
 0x1e9   :  { %v725_v61 = vmul.f32 0.01, %v631_v50  ;;  %vm701_vm14 = vcmp.gt.f32.partialorder %v631_v50, 0.0  ;;  %v746_v22 = vsel %vm698_vm12, %v628_v4, %v722_v12 }
 0x1ea   :  { %v755_v19 = vsel %vm707_vm13, %v639_v43, %v731_v13 }
 0x1eb   :  { %v1211_v42 = vpop.f32.mrb[20].mxu0  ;;  %v749_v23 = vsel %vm701_vm14, %v631_v50, %v725_v61  ;;  %v554_v63 = vpop.f32.mrb[8].mxu1  ;;  %v773_v24 = vpack.c.bf16 %v755_v19, %v752_v18 }
 0x1ec   :  { %v652_v26 = vadd.f32 %v1211_v42, %v1658_v17  ;;  %v643_v29 = vpop.f32.mrb[21].mxu0  ;;  %v770_v28 = vpack.c.bf16 %v749_v23, %v746_v22  ;;  %v1675_v5 = vadd.f32 %v554_v63, %v450_v38  ;;  %v556_v31 = vpop.f32.mrb[9].mxu1 }
 0x1ed   :  { %v644_v33 = vadd.f32 %v643_v29, %v1627_v58  ;;  %v1212_v35 = vpop.f32.mrb[22].mxu0  ;;  %v1682_v36 = vadd.f32 %v556_v31, %v450_v38  ;;  %v558_v39 = vpop.f32.mrb[10].mxu1 }
 0x1ee   :  { %v1691_v14 = vmul.f32 %v652_v26, %v636_v0  ;;  %v740_v44 = vmul.f32 0.01, %v652_v26  ;;  %v655_v20 = vadd.f32 %v1212_v35, %v1660_v32  ;;  %v646_v30 = vpop.f32.mrb[23].mxu0  ;;  %1213 = vmatprep.subr.bf16.mxu1 %v770_v28  ;;  %vm696_vm15 = vcmp.gt.f32.partialorder %v1675_v5, 0.0  ;;  %v560_v15 = vpop.f32.mrb[11].mxu1 }
 0x1ef   :  { %v1695_v49 = vmul.f32 %v644_v33, %v628_v4  ;;  %v734_v51 = vmul.f32 0.01, %v644_v33  ;;  %v647_v52 = vadd.f32 %v646_v30, %v1631_v62  ;;  %v720_v34 = vmul.f32 0.01, %v1675_v5  ;;  %1214 = vmatpush3.bf16.msra.mxu1 %v770_v28 }
 0x1f0   :  { %v1699_v6 = vmul.f32 %v655_v20, %v639_v43  ;;  %v743_v53 = vmul.f32 0.01, %v655_v20  ;;  %v721_v37 = vmul.f32 0.01, %v1682_v36  ;;  %1215 = vmatprep.subr.bf16.mxu1 %v773_v24  ;;  %v1703_v38 = vadd.f32 %v558_v39, %v1621_v57 }
 0x1f1   :  { %v1705_v59 = vmul.f32 %v647_v52, %v631_v50  ;;  %v737_v0 = vmul.f32 0.01, %v647_v52  ;;  %v1708_v3 = vadd.f32 %v560_v15, %v1621_v57  ;;  %vm710_vm0 = vcmp.gt.f32.partialorder %v644_v33, 0.0 }
 0x1f2   :  { %vm699_vm2 = vcmp.gt.f32.partialorder %v1703_v38, 0.0  ;;  %v723_v4 = vmul.f32 0.01, %v1703_v38  ;;  %vm713_vm3 = vcmp.gt.f32.partialorder %v647_v52, 0.0  ;;  %v758_v7 = vsel %vm710_vm0, %v644_v33, %v734_v51 }
 0x1f3   :  { %v724_v8 = vmul.f32 0.01, %v1708_v3  ;;  %1216 = vmatpush3.bf16.msra.mxu1 %v773_v24  ;;  %v761_v43 = vsel %vm713_vm3, %v647_v52, %v737_v0  ;;  %v564_v46 = vpop.f32.mrb[12].mxu1  ;;  %vm716_vm4 = vcmp.gt.f32.partialorder %v652_v26, 0.0  ;;  %vm719_vm5 = vcmp.gt.f32.partialorder %v655_v20, 0.0 }
 0x1f4   :  { %v776_v12 = vpack.c.bf16 %v761_v43, %v758_v7  ;;  %v1714_v50 = vadd.f32 %v564_v46, %v1623_v47  ;;  %v566_v57 = vpop.f32.mrb[13].mxu1  ;;  %v764_v13 = vsel %vm716_vm4, %v652_v26, %v740_v44  ;;  %v767_v61 = vsel %vm719_vm5, %v655_v20, %v743_v53  ;;  %v1746_v44 = vld [vmem:[%s1891_s6 + $0x8] sm:$0xff]  }
 0x1f5   :  { %v1717_v18 = vadd.f32 %v566_v57, %v1623_v47  ;;  %v779_v19 = vpack.c.bf16 %v767_v61, %v764_v13  ;;  %v568_v42 = vpop.f32.mrb[14].mxu1  ;;  %vm697_vm6 = vcmp.gt.f32.partialorder %v1682_v36, 0.0  ;;  %vm700_vm7 = vcmp.gt.f32.partialorder %v1708_v3, 0.0 }
 0x1f6   :  { %1217 = vmatprep.subr.bf16.mxu1 %v776_v12  ;;  %vm702_vm8 = vcmp.gt.f32.partialorder %v1714_v50, 0.0  ;;  %v726_v22 = vmul.f32 0.01, %v1714_v50  ;;  %v1724_v23 = vadd.f32 %v568_v42, %v1625_v55  ;;  %v570_v63 = vpop.f32.mrb[15].mxu1  ;;  %v745_v24 = vsel %vm697_vm6, %v1682_v36, %v721_v37  ;;  %v1759_v37 = vld [vmem:[%s1891_s6 + $0x10] sm:$0xff]  }
 0x1f7   :  { %1218 = vmatpush3.bf16.msra.mxu1 %v776_v12  ;;  %v727_v47 = vmul.f32 0.01, %v1717_v18  ;;  %v1729_v26 = vadd.f32 %v570_v63, %v1625_v55  ;;  %v748_v29 = vsel %vm700_vm7, %v1708_v3, %v724_v8  ;;  %v744_v28 = vsel %vm696_vm15, %v1675_v5, %v720_v34 }
 0x1f8   :  { %1219 = vmatprep.subr.bf16.mxu1 %v779_v19  ;;  %vm705_vm9 = vcmp.gt.f32.partialorder %v1724_v23, 0.0  ;;  %v729_v31 = vmul.f32 0.01, %v1724_v23  ;;  %v769_v33 = vpack.c.bf16 %v748_v29, %v745_v24  ;;  %v747_v35 = vsel %vm699_vm2, %v1703_v38, %v723_v4 }
 0x1f9   :  { %v730_v39 = vmul.f32 0.01, %v1729_v26  ;;  %v768_v55 = vpack.c.bf16 %v747_v35, %v744_v28  ;;  %vm703_vm10 = vcmp.gt.f32.partialorder %v1717_v18, 0.0  ;;  %vm706_vm11 = vcmp.gt.f32.partialorder %v1729_v26, 0.0 }
 0x1fa   :  { %868 = vmatprep.subr.bf16.mxu0 %v769_v33  ;;  %v751_v20 = vsel %vm703_vm10, %v1717_v18, %v727_v47  ;;  %v750_v30 = vsel %vm702_vm8, %v1714_v50, %v726_v22  ;;  %v753_v15 = vsel %vm705_vm9, %v1724_v23, %v729_v31  ;;  %v680_v51 = vmul.f32 %v1685_v40, %v1691_v14 }
 0x1fb   :  { %869 = vmatpush1.bf16.msra.mxu0 %v768_v55  ;;  %1220 = vmatpush3.bf16.msra.mxu1 %v779_v19  ;;  %v574_v52 = vpop.f32.mrb[16].mxu1  ;;  %v754_v34 = vsel %vm706_vm11, %v1729_v26, %v730_v39  ;;  %v771_v53 = vpack.c.bf16 %v753_v15, %v750_v30  ;;  %v674_v0 = vmul.f32 %v1685_v40, %v1695_v49 }
 0x1fc   :  { %v575_v4 = vadd.f32 %v574_v52, %v1627_v58  ;;  %v576_v7 = vpop.f32.mrb[17].mxu1  ;;  %v772_v8 = vpack.c.bf16 %v754_v34, %v751_v20  ;;  %v1765_v14 = vadd.f32 %v680_v51, %v1639_v10  ;;  %v1769_v43 = vmul.f32 %v1629_v60, %v1593_v41 }
 0x1fd   :  { %v577_v46 = vadd.f32 %v576_v7, %v1627_v58  ;;  %v578_v12 = vpop.f32.mrb[18].mxu1  ;;  %v1773_v57 = vadd.f32 %v674_v0, %v1644_v1  ;;  %v683_v49 = vmul.f32 %v1685_v40, %v1699_v6  ;;  %v677_v13 = vmul.f32 %v1685_v40, %v1705_v59 }
 0x1fe   :  { %1222 = vmatmul.mubr.msk.bf16.vlgmr.msra.gmra.mrb[24].mxu1 %vm507_vm1, %v1746_v44  ;;  %v659_v10 = vmul.f32 %v575_v4, %v1675_v5  ;;  %vm708_vm12 = vcmp.gt.f32.partialorder %v575_v4, 0.0  ;;  %v732_v41 = vmul.f32 0.01, %v575_v4  ;;  %v579_v61 = vadd.f32 %v578_v12, %v1631_v62  ;;  %v580_v58 = vpop.f32.mrb[19].mxu1  ;;  %870 = vmatprep.subr.bf16.mxu0 %v772_v8 }
 0x1ff   :  { %v660_v1 = vmul.f32 %v577_v46, %v1682_v36  ;;  %v733_v19 = vmul.f32 0.01, %v577_v46  ;;  %v581_v42 = vadd.f32 %v580_v58, %v1631_v62  ;;  %871 = vmatpush1.bf16.msra.mxu0 %v771_v53  ;;  %1225 = vmatprep.mubr.msk.bf16.mxu1 %vm507_vm1, %v1759_v37  ;;  %vm709_vm13 = vcmp.gt.f32.partialorder %v577_v46, 0.0  ;;  %v1257_v36 = vld [vmem:[%s1891_s6 + $0x18] sm:$0xff]  }
 0x200   :  { %v662_v6 = vmul.f32 %v579_v61, %v1703_v38  ;;  %vm711_vm14 = vcmp.gt.f32.partialorder %v579_v61, 0.0  ;;  %v735_v5 = vmul.f32 0.01, %v579_v61  ;;  %v756_v59 = vsel %vm708_vm12, %v575_v4, %v732_v41 }
 0x201   :  { %v663_v22 = vmul.f32 %v581_v42, %v1708_v3  ;;  %v736_v63 = vmul.f32 0.01, %v581_v42  ;;  %vm712_vm15 = vcmp.gt.f32.partialorder %v581_v42, 0.0  ;;  %v757_v24 = vsel %vm709_vm13, %v577_v46, %v733_v19 }
 0x202   :  { %v759_v62 = vsel %vm711_vm14, %v579_v61, %v735_v5  ;;  %v1793_v47 = vadd.f32 %v683_v49, %v1648_v56  ;;  %v1796_v29 = vadd.f32 %v677_v13, %v1652_v27  ;;  %v672_v38 = vmul.f32 %v1685_v40, %v659_v10 }
 0x203   :  { %v584_v28 = vpop.f32.mrb[20].mxu1  ;;  %v760_v31 = vsel %vm712_vm15, %v581_v42, %v736_v63  ;;  %v774_v33 = vpack.c.bf16 %v759_v62, %v756_v59  ;;  %v673_v3 = vmul.f32 %v1685_v40, %v660_v1  ;;  %v675_v35 = vmul.f32 %v1685_v40, %v662_v6 }
 0x204   :  { %v585_v39 = vadd.f32 %v584_v28, %v1658_v17  ;;  %v586_v55 = vpop.f32.mrb[21].mxu1  ;;  %v775_v20 = vpack.c.bf16 %v760_v31, %v757_v24  ;;  %v1803_v30 = vadd.f32 %v672_v38, %v1656_v16  ;;  %v345_v56 = vmul.f32 %v1629_v60, %v1596_v48 }
 0x205   :  { %v587_v27 = vadd.f32 %v586_v55, %v1658_v17  ;;  %v588_v15 = vpop.f32.mrb[22].mxu1  ;;  %v1809_v51 = vadd.f32 %v673_v3, %v1664_v45  ;;  %v1812_v52 = vadd.f32 %v675_v35, %v1668_v21  ;;  %v676_v34 = vmul.f32 %v1685_v40, %v663_v22 }
 0x206   :  { %1226 = vmatmul.mubr.msk.bf16.gmra.mrb[28].mxu1 %vm507_vm1, %v1257_v36  ;;  %v665_v53 = vmul.f32 %v585_v39, %v1714_v50  ;;  %vm714_vm0 = vcmp.gt.f32.partialorder %v585_v39, 0.0  ;;  %v738_v16 = vmul.f32 0.01, %v585_v39  ;;  %v589_v0 = vadd.f32 %v588_v15, %v1660_v32  ;;  %v590_v48 = vpop.f32.mrb[23].mxu1  ;;  %872 = vmatprep.subr.bf16.mxu0 %v775_v20 }
 0x207   :  { %v666_v60 = vmul.f32 %v587_v27, %v1717_v18  ;;  %v739_v17 = vmul.f32 0.01, %v587_v27  ;;  %v591_v45 = vadd.f32 %v590_v48, %v1660_v32  ;;  %873 = vmatpush1.bf16.msra.mxu0 %v774_v33  ;;  %vm715_vm2 = vcmp.gt.f32.partialorder %v587_v27, 0.0 }
 0x208   :  { %v668_v21 = vmul.f32 %v589_v0, %v1724_v23  ;;  %vm717_vm3 = vcmp.gt.f32.partialorder %v589_v0, 0.0  ;;  %v741_v4 = vmul.f32 0.01, %v589_v0  ;;  %v762_v7 = vsel %vm714_vm0, %v585_v39, %v738_v16 }
 0x209   :  { %v669_v50 = vmul.f32 %v591_v45, %v1729_v26  ;;  %v742_v8 = vmul.f32 0.01, %v591_v45  ;;  %vm718_vm4 = vcmp.gt.f32.partialorder %v591_v45, 0.0  ;;  %v763_v46 = vsel %vm715_vm2, %v587_v27, %v739_v17 }
 0x20a   :  { %v765_v12 = vsel %vm717_vm3, %v589_v0, %v741_v4  ;;  %v1823_v49 = vadd.f32 %v676_v34, %v1672_v25  ;;  %v678_v18 = vmul.f32 %v1685_v40, %v665_v53  ;;  %v679_v32 = vmul.f32 %v1685_v40, %v666_v60 }
 0x20b   :  { %v766_v13 = vsel %vm718_vm4, %v591_v45, %v742_v8  ;;  %v777_v10 = vpack.c.bf16 %v765_v12, %v762_v7  ;;  %v681_v23 = vmul.f32 %v1685_v40, %v668_v21  ;;  %v682_v41 = vmul.f32 %v1685_v40, %v669_v50  ;;  %v804_v40 = vpop.permute.xlu1 %803 }
 0x20c   :  { %v778_v61 = vpack.c.bf16 %v766_v13, %v763_v46  ;;  %v1830_v26 = vadd.f32 %v678_v18, %v1679_v9  ;;  %v1833_v58 = vadd.f32 %v679_v32, %v1689_v11  ;;  %v799_v9 = vpop.permute.xlu0 %798 }
 0x20d   :  { %v1836_v25 = vadd.f32 %v681_v23, %v1769_v43  ;;  %v1838_v1 = vadd.f32 %v682_v41, %v345_v56 }
 0x20e   :  { %874 = vmatprep.subr.bf16.mxu0 %v778_v61 }
 0x20f   :  { %875 = vmatpush1.bf16.msra.mxu0 %v777_v10  ;;  %v824_v43 = vpop.permute.xlu1 %823 }
 0x210   :  { %v819_v11 = vpop.permute.xlu0 %818 }
 0x212   :  { %1149 = vmatmul.mubr.msk.bf16.vlgmr.msra.gmra.mrb[24].mxu0 %vm507_vm1, %v1617_v54 }
 0x213   :  { %910 = vmatprep.mubr.bf16.mxu0 %v1285_v2 }
 0x214   :  { %v1850_v6 = vpop.permute.xlu0 %808 }
 0x218   :  { %v1854_v22 = vpop.permute.xlu0 %813 }
 0x21a   :  { %1150 = vmatmul.mubr.msk.bf16.gmra.mrb[28].mxu0 %vm507_vm1, %v1746_v44  ;;  %v1852_v44 = vpop.permute.xlu1 %828 }
 0x21b   :  { %920 = vmatprep.mubr.bf16.mxu0 %v1285_v2 }
 0x21e   :  { %v1858_v24 = vpop.permute.xlu1 %833 }
 0x222   :  { %1151 = vmatmul.mubr.msk.bf16.gmra.mrb[32].mxu0 %vm507_vm1, %v1759_v37 }
 0x223   :  { %930 = vmatprep.mubr.bf16.mxu0 %v1285_v2 }
 0x22a   :  { %1152 = vmatmul.mubr.msk.bf16.gmra.mrb[36].mxu0 %vm507_vm1, %v1257_v36 }
 0x2d1   :  { %v1223_v19 = vpop.f32.mrb[24].mxu1 }
 0x2d2   :  { %v975_v54 = vpop.f32.mrb[25].mxu1  ;;  %v984_v37 = vadd.f32 %v1223_v19, %v1850_v6 }
 0x2d3   :  { %v1224_v42 = vpop.f32.mrb[26].mxu1  ;;  %v976_v36 = vadd.f32 %v975_v54, %v799_v9 }
 0x2d4   :  { %v978_v5 = vpop.f32.mrb[27].mxu1  ;;  %v987_v28 = vadd.f32 %v1224_v42, %v1854_v22 }
 0x2d5   :  { %v979_v35 = vadd.f32 %v978_v5, %v804_v40 }
 0x2d9   :  { %v1227_v59 = vpop.f32.mrb[28].mxu1 }
 0x2da   :  { %v1000_v2 = vadd.f32 %v1227_v59, %v1852_v44  ;;  %v991_v63 = vpop.f32.mrb[29].mxu1 }
 0x2db   :  { %v992_v62 = vadd.f32 %v991_v63, %v819_v11  ;;  %v1228_v38 = vpop.f32.mrb[30].mxu1 }
 0x2dc   :  { %v1014_v31 = vmul.f32 %v1000_v2, %v984_v37  ;;  %v1003_v33 = vadd.f32 %v1228_v38, %v1858_v24  ;;  %v994_v3 = vpop.f32.mrb[31].mxu1 }
 0x2dd   :  { %v1008_v39 = vmul.f32 %v992_v62, %v976_v36  ;;  %v995_v55 = vadd.f32 %v994_v3, %v824_v43 }
 0x2de   :  { %v1026_v20 = vadd.f32 %v1014_v31, %v1765_v14  ;;  %v1017_v56 = vmul.f32 %v1003_v33, %v987_v28 }
 0x2df   :  { %v1020_v27 = vadd.f32 %v1008_v39, %v1773_v57  ;;  %v1011_v15 = vmul.f32 %v995_v55, %v979_v35 }
 0x2e0   :  { %v1029_v34 = vadd.f32 %v1017_v56, %v1793_v47 }
 0x2e1   :  { %v1023_v53 = vadd.f32 %v1011_v15, %v1796_v29 }
 0x2e3   :  { %v1048_v16 = vadd.f32 %v1023_v53, %v1020_v27 }
 0x2e5   :  { %v1049_v0 = vadd.f32 %v1048_v16, %v1026_v20  ;;  %v902_v48 = vpop.f32.mrb[24].mxu0 }
 0x2e6   :  { %v904_v60 = vpop.f32.mrb[25].mxu0  ;;  %v903_v12 = vadd.f32 %v902_v48, %v799_v9 }
 0x2e7   :  { %v1050_v17 = vadd.f32 %v1049_v0, %v1029_v34  ;;  %v906_v45 = vpop.f32.mrb[26].mxu0  ;;  %v905_v32 = vadd.f32 %v904_v60, %v799_v9 }
 0x2e8   :  { %v908_v21 = vpop.f32.mrb[27].mxu0  ;;  %v907_v29 = vadd.f32 %v906_v45, %v804_v40 }
 0x2e9   :  { %v1051_v14 = vrot.slane %v1050_v17, 4  ;;  %v909_v19 = vadd.f32 %v908_v21, %v804_v40 }
 0x2eb   :  { %v1052_v61 = vadd.f32 %v1051_v14, %v1050_v17 }
 0x2ed   :  { %v912_v4 = vpop.f32.mrb[28].mxu0  ;;  %v1053_v36 = vrot.slane %v1052_v61, 2 }
 0x2ee   :  { %v914_v7 = vpop.f32.mrb[29].mxu0  ;;  %v913_v62 = vadd.f32 %v912_v4, %v1850_v6 }
 0x2ef   :  { %v916_v50 = vpop.f32.mrb[30].mxu0 }
 0x2f0   :  { %v918_v8 = vpop.f32.mrb[31].mxu0 }
 0x2f1   :  { %v919_v39 = vadd.f32 %v918_v8, %v1854_v22 }
 0x2f5   :  { %v922_v46 = vpop.f32.mrb[32].mxu0 }
 0x2f6   :  { %v923_v57 = vadd.f32 %v922_v46, %v819_v11  ;;  %v924_v18 = vpop.f32.mrb[33].mxu0 }
 0x2f7   :  { %v925_v47 = vadd.f32 %v924_v18, %v819_v11  ;;  %v926_v13 = vpop.f32.mrb[34].mxu0 }
 0x2f8   :  { %v1006_v10 = vmul.f32 %v923_v57, %v903_v12  ;;  %v927_v23 = vadd.f32 %v926_v13, %v824_v43  ;;  %v928_v41 = vpop.f32.mrb[35].mxu0 }
 0x2f9   :  { %v1007_v54 = vmul.f32 %v925_v47, %v905_v32  ;;  %v929_v42 = vadd.f32 %v928_v41, %v824_v43  ;;  %v915_v43 = vadd.f32 %v914_v7, %v1850_v6  ;;  %v1082_v41 = vlaneseq }
 0x2fa   :  { %v1018_v5 = vadd.f32 %v1006_v10, %v1803_v30  ;;  %v1009_v59 = vmul.f32 %v927_v23, %v907_v29  ;;  %v1286_v10 = vmov 1966171168  }
 0x2fb   :  { %v1019_v37 = vadd.f32 %v1007_v54, %v1809_v51  ;;  %v1010_v2 = vmul.f32 %v929_v42, %v909_v19  ;;  %v917_v51 = vadd.f32 %v916_v50, %v1854_v22  ;;  %v1080_v23 = vunpack.c.l.s4 %v1286_v10 }
 0x2fc   :  { %v1021_v63 = vadd.f32 %v1009_v59, %v1812_v52  ;;  %v1083_v19 = vshrl.u32 %v1082_v41, 7  ;;  %vm1104_vm1 = vcmp.lt.s32.totalorder %v1082_v41, 384 }
 0x2fd   :  { %v1022_v9 = vadd.f32 %v1010_v2, %v1823_v49  ;;  %v932_v11 = vpop.f32.mrb[36].mxu0  ;;  %v1054_v49 = vadd.f32 %v1053_v36, %v1052_v61  ;;  %v1081_v61 = vunpack.c.0.s8 %v1080_v23 }
 0x2fe   :  { %v1030_v38 = vadd.f32 %v1021_v63, %v1018_v5  ;;  %v933_v28 = vadd.f32 %v932_v11, %v1852_v44  ;;  %v934_v40 = vpop.f32.mrb[37].mxu0 }
 0x2ff   :  { %v1039_v31 = vadd.f32 %v1022_v9, %v1019_v37  ;;  %v935_v30 = vadd.f32 %v934_v40, %v1852_v44  ;;  %v936_v33 = vpop.f32.mrb[38].mxu0  ;;  %v1055_v53 = vrot.slane %v1054_v49, 1  ;;  %v1084_v5 = vsub.s32 %v1081_v61, %v1083_v19 }
 0x300   :  { %v1012_v3 = vmul.f32 %v933_v28, %v913_v62  ;;  %v937_v52 = vadd.f32 %v936_v33, %v1858_v24  ;;  %v938_v35 = vpop.f32.mrb[39].mxu0 }
 0x301   :  { %v1013_v55 = vmul.f32 %v935_v30, %v915_v43  ;;  %v939_v20 = vadd.f32 %v938_v35, %v1858_v24  ;;  %v1056_v22 = vadd.f32 %v1055_v53, %v1054_v49 }
 0x302   :  { %v1024_v56 = vadd.f32 %v1012_v3, %v1830_v26  ;;  %v1015_v27 = vmul.f32 %v937_v52, %v917_v51 }
 0x303   :  { %v1025_v6 = vadd.f32 %v1013_v55, %v1833_v58  ;;  %v1016_v15 = vmul.f32 %v939_v20, %v919_v39  ;;  %v1159_v26 = vmul.f32 -1.442695, %v1056_v22 }
 0x304   :  { %v1031_v44 = vadd.f32 %v1030_v38, %v1024_v56  ;;  %v1027_v34 = vadd.f32 %v1015_v27, %v1836_v25 }
 0x305   :  { %v1040_v16 = vadd.f32 %v1039_v31, %v1025_v6  ;;  %v1028_v0 = vadd.f32 %v1016_v15, %v1838_v1  ;;  %1258 = vpow2.f32 %v1159_v26 }
 0x306   :  { %v1032_v48 = vadd.f32 %v1031_v44, %v1027_v34 }
 0x307   :  { %v1041_v60 = vadd.f32 %v1040_v16, %v1028_v0 }
 0x308   :  { %v1033_v17 = vrot.slane %v1032_v48, 4 }
 0x309   :  { %v1042_v45 = vrot.slane %v1041_v60, 4 }
 0x30a   :  { %v1034_v21 = vadd.f32 %v1033_v17, %v1032_v48 }
 0x30b   :  { %v1043_v24 = vadd.f32 %v1042_v45, %v1041_v60 }
 0x30c   :  { %v1035_v4 = vrot.slane %v1034_v21, 2 }
 0x30d   :  { %v1044_v7 = vrot.slane %v1043_v24, 2 }
 0x30e   :  { %v1036_v50 = vadd.f32 %v1035_v4, %v1034_v21 }
 0x30f   :  { %v1045_v58 = vadd.f32 %v1044_v7, %v1043_v24  ;;  %v1259_v1 = vpop.eup %1258 }
 0x310   :  { %v1037_v8 = vrot.slane %v1036_v50, 1  ;;  %v1068_v18 = vadd.f32 1.0, %v1259_v1 }
 0x311   :  { %v1046_v14 = vrot.slane %v1045_v58, 1 }
 0x312   :  { %v1038_v25 = vadd.f32 %v1037_v8, %v1036_v50 }
 0x313   :  { %v1047_v46 = vadd.f32 %v1046_v14, %v1045_v58 }
 0x314   :  { %v1157_v12 = vmul.f32 -1.442695, %v1038_v25 }
 0x315   :  { %v1158_v57 = vmul.f32 -1.442695, %v1047_v46 }
 0x316   :  { %1260 = vpow2.f32 %v1157_v12 }
 0x317   :  { %1262 = vpow2.f32 %v1158_v57 }
 0x318   :  { %1264 = vrcp.f32 %v1068_v18 }
 0x320   :  { %v1261_v32 = vpop.eup %1260 }
 0x321   :  { %v1263_v47 = vpop.eup %1262  ;;  %v1066_v13 = vadd.f32 1.0, %v1261_v32 }
 0x322   :  { %v1067_v29 = vadd.f32 1.0, %v1263_v47  ;;  %v1265_v54 = vpop.eup %1264 }
 0x323   :  { %1266 = vrcp.f32 %v1066_v13  ;;  %v1092_v2 = vrot.slane %v1265_v54, %v1084_v5 }
 0x324   :  { %1268 = vrcp.f32 %v1067_v29 }
 0x32d   :  { %v1267_v42 = vpop.eup %1266 }
 0x32e   :  { %v1269_v59 = vpop.eup %1268 }
 0x32f   :  { %v1078_v37 = vcombine.low %v1267_v42, %v1269_v59 }
 0x331   :  { %v1085_v63 = vrot.slane %v1078_v37, %v1084_v5 }
 0x333   :  { %v1093_v36 = vcombine.low %v1085_v63, %v1092_v2 }
 0x335   :  { %v1100_v9 = vrot.slane %v1093_v36, %v1084_v5 }
 0x337   :  { %1106 = vst.msk [vmem:[%s1893_s8] sm:$0x7] %vm1104_vm1, %v1100_v9 }

</bundles_post_ra>
